<compile_context>
chip_gen: v7x
topology: tpu7x:2x2x1
jax: 0.10.0
libtpu: 0.0.40
codegen_flags: <defaults>
</compile_context>

<pallas_src>
import functools

import jax
import jax.numpy as jnp
from jax.experimental import pallas as pl
from jax.experimental.pallas import tpu as pltpu


def _mean_pool_kernel(x_ref, mask_ref, out_ref, msum_ref, *, use_mxu):
    # Grid = (batch blocks, hidden blocks, seq blocks); seq (reduction) innermost.
    # x_ref:    (tB, tS, tH)  native dtype
    # mask_ref: (tB, tS)      native dtype, 0/1
    # out_ref:  (tB, tH)      f32 -- doubles as the accumulator (resident over s)
    # msum_ref: (tB, 1)       f32 scratch -- accumulated token count
    s_idx = pl.program_id(2)

    @pl.when(s_idx == 0)
    def _():
        out_ref[...] = jnp.zeros_like(out_ref)
        msum_ref[...] = jnp.zeros_like(msum_ref)

    x = x_ref[...]
    m = mask_ref[...]

    if use_mxu:
        # Sub-32-bit inputs: masked multiply-accumulate on the MXU as batched
        # (1, tS) @ (tS, tH) matmuls with f32 accumulation.
        psum = jnp.einsum(
            "bqs,bsh->bqh", m[:, None, :], x,
            preferred_element_type=jnp.float32)          # (tB, 1, tH) f32
        out_ref[...] += psum[:, 0, :]
    else:
        # f32 inputs: exact VPU multiply + f32 reduction (matches torch ref).
        out_ref[...] += jnp.sum(x * m[:, :, None], axis=1)

    msum_ref[...] += jnp.sum(m.astype(jnp.float32), axis=1, keepdims=True)

    @pl.when(s_idx == pl.num_programs(2) - 1)
    def _():
        # Exact division with torch.clamp(min=1e-9) semantics.
        # (Do NOT use pl.reciprocal(approx=True) here -- precision.)
        out_ref[...] = out_ref[...] / jnp.maximum(msum_ref[...], 1e-9)


def _pick_tile(dim, quantum, cap):
    """Largest t <= cap with t % quantum == 0 and dim % t == 0, else None."""
    t = (min(cap, dim) // quantum) * quantum
    while t >= quantum:
        if dim % t == 0:
            return t
        t -= quantum
    return None


_X_TILE_BUDGET = 8 << 20  # bytes per pipelined last_hidden_state buffer


def mean_pooling(last_hidden_state, attention_mask):
    """Masked mean pooling over the sequence axis.  Returns [B, H] float32."""
    x = last_hidden_state
    B0, S0, H = x.shape
    assert attention_mask.shape == (B0, S0)

    # 0/1 masks are exact in any float dtype; keeping the mask in x.dtype lets
    # the multiply run at packed rate / feed the MXU natively.
    mask = attention_mask.astype(x.dtype)

    itemsize = jnp.dtype(x.dtype).itemsize
    use_mxu = itemsize < 4

    # ---- batch tile (layout rule: tB % 8 == 0 or tB == B) -------------------
    pad_b = 0
    if B0 % 8 == 0:
        tB = 8
    elif B0 <= 64:
        tB = B0                          # full-dim block, still small
    else:
        pad_b = (-B0) % 8                # large ragged batch: pad a few rows
        tB = 8
    B = B0 + pad_b

    # ---- hidden tile: prefer full H (one contiguous DMA run per row) --------
    min_ts = S0 if S0 < 128 else 128
    if H % 128 != 0 or tB * min_ts * H * itemsize <= _X_TILE_BUDGET:
        tH = H
        # TODO(synk): pad H to a multiple of 128 when a huge, non-128-divisible
        # hidden dim would force an over-budget full-H tile.
    else:
        cap_h = max(128, _X_TILE_BUDGET // (tB * min_ts * itemsize))
        tH = _pick_tile(H, 128, cap_h) or H

    # ---- v7x megacore: guarantee >= 2 parallel (b, h) blocks when possible --
    if (B // tB) * (H // tH) < 2 and tH % 256 == 0:
        tH //= 2

    # ---- sequence tile (reduction axis, innermost grid dim) -----------------
    pad_s = 0
    if tB * S0 * tH * itemsize <= _X_TILE_BUDGET:
        tS = S0                          # whole sequence in one step
    else:
        if S0 % 128 != 0:
            pad_s = (-S0) % 128          # padded tokens carry mask 0 -> no-ops
        S_p = S0 + pad_s
        cap_s = max(128, _X_TILE_BUDGET // (tB * tH * itemsize))
        tS = _pick_tile(S_p, 128, cap_s) or 128
    S = S0 + pad_s

    if pad_b or pad_s:
        x = jnp.pad(x, ((0, pad_b), (0, pad_s), (0, 0)))
        mask = jnp.pad(mask, ((0, pad_b), (0, pad_s)))

    grid = (B // tB, H // tH, S // tS)

    # ---- pipelining depth & explicit VMEM budget -----------------------------
    x_tile_bytes = tB * tS * tH * itemsize
    deep_pipeline = (x_tile_bytes <= (2 << 20)) and (grid[0] * grid[1] * grid[2] >= 4)
    n_buf = 3 if deep_pipeline else 2
    est = (n_buf * x_tile_bytes
           + 2 * tB * max(tS, 128) * itemsize       # mask tiles (lane padding)
           + 2 * tB * max(tH, 128) * 4              # output tiles
           + (1 << 20))                             # scratch / layout slack
    vmem_limit = int(min(64 << 20, max(16 << 20, est + (4 << 20))))

    x_index = lambda b, h, s: (b, s, h)
    if deep_pipeline:
        x_spec = pl.BlockSpec((tB, tS, tH), x_index, pipeline_mode=pl.Buffered(3))
    else:
        x_spec = pl.BlockSpec((tB, tS, tH), x_index)

    out = pl.pallas_call(
        functools.partial(_mean_pool_kernel, use_mxu=use_mxu),
        out_shape=jax.ShapeDtypeStruct((B, H), jnp.float32),
        grid_spec=pltpu.PrefetchScalarGridSpec(
            num_scalar_prefetch=0,
            grid=grid,
            in_specs=[
                x_spec,
                pl.BlockSpec((tB, tS), lambda b, h, s: (b, s)),
            ],
            out_specs=pl.BlockSpec((tB, tH), lambda b, h, s: (b, h)),
            scratch_shapes=[pltpu.VMEM((tB, 1), jnp.float32)],
        ),
        compiler_params=pltpu.CompilerParams(
            dimension_semantics=("parallel", "parallel", "arbitrary"),
            vmem_limit_bytes=vmem_limit,
        ),
        cost_estimate=pl.CostEstimate(
            flops=2 * B * S * H,
            bytes_accessed=B * S * H * itemsize + B * S * itemsize + B * H * 4,
            transcendentals=0,
        ),
    )(x, mask)

    return out[:B0] if pad_b else out


def _reference(last_hidden_state, attention_mask):
    mask = attention_mask[..., None].astype(jnp.float32)
    sum_embeddings = jnp.sum(last_hidden_state.astype(jnp.float32) * mask, axis=1)
    sum_mask = jnp.maximum(jnp.sum(mask, axis=1), 1e-9)
    return sum_embeddings / sum_mask


if __name__ == "__main__":
    key = jax.random.PRNGKey(0)

    # --- primary small test (shapes implied by the module) ------------------
    k1, k2 = jax.random.split(key)
    B, S, H = 2, 8, 32
    last_hidden_state = jax.random.normal(k1, (B, S, H), dtype=jnp.float32)
    attention_mask = (jax.random.uniform(k2, (B, S)) > 0.3).astype(jnp.int32)

    out = mean_pooling(last_hidden_state, attention_mask)
    jax.block_until_ready(out)

    ref = _reference(last_hidden_state, attention_mask)
    assert out.shape == (B, H)
    assert jnp.allclose(out, ref, atol=1e-5, rtol=1e-5), "mismatch vs reference (small)"

    # --- secondary test: multi-step sequence accumulation + split hidden ----
    k3, k4 = jax.random.split(jax.random.PRNGKey(1))
    B2, S2, H2 = 8, 4096, 256          # grid = (1, 2, 2): 2 seq steps, 2 h blocks
    x2 = jax.random.normal(k3, (B2, S2, H2), dtype=jnp.float32)
    m2 = (jax.random.uniform(k4, (B2, S2)) > 0.5).astype(jnp.int32)

    out2 = mean_pooling(x2, m2)
    jax.block_until_ready(out2)
    ref2 = _reference(x2, m2)
    assert jnp.allclose(out2, ref2, atol=1e-4, rtol=1e-4), "mismatch vs reference (tiled)"

    print("KERNEL_OK")
</pallas_src>

<mosaic_0001>
module attributes {stable_mosaic.version = 11 : i64} {
  func.func @_mean_pool_kernel(%arg0: i32, %arg1: i32, %arg2: i32, %arg3: memref<2x8x32xf32, #tpu.memory_space<vmem>>, %arg4: memref<2x8xf32, #tpu.memory_space<vmem>>, %arg5: memref<2x32xf32, #tpu.memory_space<vmem>>, %arg6: memref<2x1xf32, #tpu.memory_space<vmem>>) attributes {dimension_semantics = [#tpu.dimension_semantics<parallel>, #tpu.dimension_semantics<parallel>, #tpu.dimension_semantics<arbitrary>], iteration_bounds = array<i64: 1, 1, 1>, scalar_prefetch = 0 : i64, scratch_operands = 1 : i64, tpu.core_type = #tpu.core_type<tc>, window_params = [{transform_indices = @transform_0, window_bounds = array<i64: 2, 8, 32>}, {transform_indices = @transform_1, window_bounds = array<i64: 2, 8>}, {transform_indices = @transform_2, window_bounds = array<i64: 2, 32>}]} {
    %c0_i32 = arith.constant 0 : i32
    %0 = arith.cmpi eq, %arg2, %c0_i32 : i32
    %1 = arith.extui %0 : i1 to i32
    %c0_i32_0 = arith.constant 0 : i32
    %2 = arith.cmpi ne, %1, %c0_i32_0 : i32
    scf.if %2 {
      %cst_16 = arith.constant 0.000000e+00 : f32
      %20 = vector.broadcast %cst_16 : f32 to vector<2x32xf32>
      %c0_17 = arith.constant 0 : index
      %c0_18 = arith.constant 0 : index
      %21 = vector.load %arg5[%c0_17, %c0_18] : memref<2x32xf32, #tpu.memory_space<vmem>>, vector<2x32xf32>
      tpu.vector_store %arg5[%c0_17, %c0_18], %20 {strides = array<i32>} : memref<2x32xf32, #tpu.memory_space<vmem>>, vector<2x32xf32>,
      %cst_19 = arith.constant 0.000000e+00 : f32
      %22 = vector.broadcast %cst_19 : f32 to vector<2x1xf32>
      %c0_20 = arith.constant 0 : index
      %c0_21 = arith.constant 0 : index
      %23 = vector.load %arg6[%c0_20, %c0_21] : memref<2x1xf32, #tpu.memory_space<vmem>>, vector<2x1xf32>
      tpu.vector_store %arg6[%c0_20, %c0_21], %22 {strides = array<i32>} : memref<2x1xf32, #tpu.memory_space<vmem>>, vector<2x1xf32>,
    } else {
    }
    %c0 = arith.constant 0 : index
    %c0_1 = arith.constant 0 : index
    %c0_2 = arith.constant 0 : index
    %3 = vector.load %arg3[%c0, %c0_1, %c0_2] : memref<2x8x32xf32, #tpu.memory_space<vmem>>, vector<2x8x32xf32>
    %c0_3 = arith.constant 0 : index
    %c0_4 = arith.constant 0 : index
    %4 = vector.load %arg4[%c0_3, %c0_4] : memref<2x8xf32, #tpu.memory_space<vmem>>, vector<2x8xf32>
    %c0_5 = arith.constant 0 : index
    %c0_6 = arith.constant 0 : index
    %5 = vector.load %arg5[%c0_5, %c0_6] : memref<2x32xf32, #tpu.memory_space<vmem>>, vector<2x32xf32>
    %6 = vector.shape_cast %4 : vector<2x8xf32> to vector<2x8x1xf32>
    %7 = vector.broadcast %6 : vector<2x8x1xf32> to vector<2x8x32xf32>
    %8 = arith.mulf %3, %7 : vector<2x8x32xf32>
    %cst = arith.constant dense<0.000000e+00> : vector<2x32xf32>
    %9 = vector.multi_reduction <add>, %8, %cst [1] : vector<2x8x32xf32> to vector<2x32xf32>
    %10 = arith.addf %5, %9 : vector<2x32xf32>
    %c0_7 = arith.constant 0 : index
    %c0_8 = arith.constant 0 : index
    %11 = vector.load %arg5[%c0_7, %c0_8] : memref<2x32xf32, #tpu.memory_space<vmem>>, vector<2x32xf32>
    tpu.vector_store %arg5[%c0_7, %c0_8], %10 {strides = array<i32>} : memref<2x32xf32, #tpu.memory_space<vmem>>, vector<2x32xf32>,
    %c0_9 = arith.constant 0 : index
    %c0_10 = arith.constant 0 : index
    %12 = vector.load %arg6[%c0_9, %c0_10] : memref<2x1xf32, #tpu.memory_space<vmem>>, vector<2x1xf32>
    %cst_11 = arith.constant dense<0.000000e+00> : vector<2xf32>
    %13 = vector.multi_reduction <add>, %4, %cst_11 [1] : vector<2x8xf32> to vector<2xf32>
    %14 = vector.shape_cast %13 : vector<2xf32> to vector<2x1xf32>
    %15 = arith.addf %12, %14 : vector<2x1xf32>
    %c0_12 = arith.constant 0 : index
    %c0_13 = arith.constant 0 : index
    %16 = vector.load %arg6[%c0_12, %c0_13] : memref<2x1xf32, #tpu.memory_space<vmem>>, vector<2x1xf32>
    tpu.vector_store %arg6[%c0_12, %c0_13], %15 {strides = array<i32>} : memref<2x1xf32, #tpu.memory_space<vmem>>, vector<2x1xf32>,
    %c0_i32_14 = arith.constant 0 : i32
    %17 = arith.cmpi eq, %arg2, %c0_i32_14 : i32
    %18 = arith.extui %17 : i1 to i32
    %c0_i32_15 = arith.constant 0 : i32
    %19 = arith.cmpi ne, %18, %c0_i32_15 : i32
    scf.if %19 {
      %c0_16 = arith.constant 0 : index
      %c0_17 = arith.constant 0 : index
      %20 = vector.load %arg5[%c0_16, %c0_17] : memref<2x32xf32, #tpu.memory_space<vmem>>, vector<2x32xf32>
      %c0_18 = arith.constant 0 : index
      %c0_19 = arith.constant 0 : index
      %21 = vector.load %arg6[%c0_18, %c0_19] : memref<2x1xf32, #tpu.memory_space<vmem>>, vector<2x1xf32>
      %cst_20 = arith.constant 9.99999971E-10 : f32
      %22 = vector.broadcast %cst_20 : f32 to vector<2x1xf32>
      %23 = arith.maximumf %21, %22 : vector<2x1xf32>
      %24 = vector.broadcast %23 : vector<2x1xf32> to vector<2x32xf32>
      %25 = arith.divf %20, %24 : vector<2x32xf32>
      %c0_21 = arith.constant 0 : index
      %c0_22 = arith.constant 0 : index
      %26 = vector.load %arg5[%c0_21, %c0_22] : memref<2x32xf32, #tpu.memory_space<vmem>>, vector<2x32xf32>
      tpu.vector_store %arg5[%c0_21, %c0_22], %25 {strides = array<i32>} : memref<2x32xf32, #tpu.memory_space<vmem>>, vector<2x32xf32>,
    } else {
    }
    return
  }
  func.func @transform_0(%arg0: i32, %arg1: i32, %arg2: i32) -> (i32, i32, i32) {
    %c0_i32 = arith.constant 0 : i32
    return %arg0, %arg2, %arg1 : i32, i32, i32
  }
  func.func @transform_1(%arg0: i32, %arg1: i32, %arg2: i32) -> (i32, i32) {
    %c0_i32 = arith.constant 0 : i32
    return %arg0, %arg2 : i32, i32
  }
  func.func @transform_2(%arg0: i32, %arg1: i32, %arg2: i32) -> (i32, i32) {
    %c0_i32 = arith.constant 0 : i32
    return %arg0, %arg1 : i32, i32
  }
}

</mosaic_0001>

<bundles_post_ra>
// kernel: tpu_custom_call.1
= control target key start
LH: loop header
LB: loop body
LE: loop exit
PB: predicated region body
PF: predicated region fallthrough
CT: control target
= control target key end

     0   :  { %7 = vsyncpa [#allocation4], 0  ;;  %s225_s0 = inlined_call_operand.hbm [shape: f32[2,8,32], index: 0, kind: input, shape index: {}]   ;;  %s226_s1 = inlined_call_operand.vmem [shape: f32[2,8], index: 1, kind: input, shape index: {}]   ;;  %s227_s2 = inlined_call_operand.hbm [shape: f32[2,32], index: 2, kind: output, shape index: {}]  }
   0x1   :  { %8 = vsyncpa [#allocation5], 0  ;;  %s172_s9 = smov [#allocation3]   ;;  %s124_s13 = scalar_lea.hbm %s225_s0, 256 }
   0x2   :  { %s14_s10 = sshll.u32 %s172_s9, 4  ;;  %p125_p0 = scmp.ne.s32.totalorder %s225_s0, %s124_s13  ;;  %s15_s10 = int_to_ptr.vmem [resolvable:$true] %s14_s10 }
   0x3   :  { %p128_p1 = scmp.lt.u32.totalorder %s124_s13, %s225_s0 }
   0x5   :  { %p130_p2 = pnand %p128_p1, %p125_p0 }
   0x7   :  { %133 = shalt.err (!%p130_p2)
}
   0x8   :  { %s134_s18 = scalar_lea.vmem %s15_s10, 256  ;;  %p139_p4 = scmp.lt.s32.totalorder %s15_s10, %s15_s10 }
   0x9   :  { %p135_p3 = scmp.ne.s32.totalorder %s15_s10, %s134_s18  ;;  %p140_p5 = scmp.lt.s32.totalorder %s134_s18, %s134_s18 }
   0xb   :  { %p141_p6 = por %p140_p5, %p139_p4 }
   0xd   :  { %p142_p7 = pnand %p141_p6, %p135_p3 }
   0xf   :  { %145 = shalt.err (!%p142_p7)
}
  0x10   :  { %s173_s19 = smov 128   ;;  %s174_s20 = smov 8  }
  0x11   :  { %20 = dma.hbm_to_vmem [thread:$0]  %s225_s0, 256, %s15_s10, [#allocation4], %s173_s19, %s173_s19, %s174_s20  }
  0x12   :  { %168 = dma.done.wait [#allocation4], 256  }
  0x13   :  { %169 = vsyncadd [#allocation4], 4294967040  ;;  %vm32_vm0 = vcmask 1024   ;;  %v175_v0 = vmov 0.0   ;;  %vm78_vm1 = vcmask 58368   ;;  %v38_v3 = vlaneseq  ;;  %v35_v10 = vld [vmem:[#allocation3 + $0x8] sm:$0xff] }
  0x14   :  { %33 = vst.msk [vmem:[#allocation2] sm:$0x3] %vm32_vm0, %v175_v0  ;;  %v36_v1 = vld [vmem:[%s226_s1] sm:$0x3]  ;;  %v176_v8 = vmov 0   ;;  %vm30_vm2 = vcmask 254976  }
  0x15   :  { %v79_v2 = vsel %vm78_vm1, %v36_v1, 0.0  ;;  %v39_v4 = vshrl.u32 %v38_v3, 7  ;;  %120 = vset.pattern.permute.xlu1 %v176_v8  ;;  %121 = vset.pattern.permute.xlu0 %v176_v8  ;;  %31 = vst.msk [vmem:[#allocation6] sm:$0x3] %vm30_vm2, %v175_v0  ;;  %vm54_vm3 = vcmask 261120   ;;  %v34_v19 = vld [vmem:[#allocation3] sm:$0xff] }
  0x16   :  { %80 = vadd.xlane.f32.xlu0 %v79_v2  ;;  %vm71_vm4 = vcmask 1041409   ;;  %s177_s0 = smov [#allocation6]  }
  0x17   :  { %v47_v5 = vsub.s32 1, %v39_v4  ;;  %v40_v7 = vsub.s32 0, %v39_v4  ;;  %s105_s1 = sshll.u32 %s177_s0, 4  ;;  %s106_s1 = int_to_ptr.vmem [resolvable:$true] %s105_s1 }
  0x18   :  { %s146_s25 = scalar_lea.vmem %s106_s1, 32  ;;  %p151_p9 = scmp.lt.s32.totalorder %s106_s1, %s106_s1 }
  0x19   :  { %v48_v6 = vrot.slane %v36_v1, %v47_v5  ;;  %v41_v9 = vrot.slane %v36_v1, %v40_v7  ;;  %p147_p8 = scmp.ne.s32.totalorder %s106_s1, %s146_s25  ;;  %p152_p10 = scmp.lt.s32.totalorder %s146_s25, %s146_s25 }
  0x1b   :  { %50 = vbcast.lane.b32.xlu1 %v48_v6, 256  ;;  %v77_v15 = vld [vmem:[#allocation2] sm:$0x3]  ;;  %p153_p11 = por %p152_p10, %p151_p9 }
  0x1c   :  { %v37_v34 = vld [vmem:[#allocation6] sm:$0x3] }
  0x1d   :  { %p154_p12 = pnand %p153_p11, %p147_p8 }
  0x2c   :  { %43 = vbcast.lane.b32.xlu0 %v41_v9, 256 }
  0x8d   :  { %v51_v11 = vpop.permute.xlu1 %50 }
  0x8e   :  { %v53_v12 = vmul.f32 %v51_v11, %v35_v10 }
  0x90   :  { %v62_v13 = vsel %vm54_vm3, %v53_v12, 0.0 }
  0x91   :  { %v63_v14 = vrot.slane %v62_v13, 4 }
  0x93   :  { %v64_v17 = vadd.f32 %v63_v14, %v62_v13 }
  0x95   :  { %v65_v20 = vrot.slane %v64_v17, 2 }
  0x97   :  { %v66_v24 = vadd.f32 %v65_v20, %v64_v17 }
  0x99   :  { %v67_v29 = vrot.slane %v66_v24, 1 }
  0x9b   :  { %v68_v32 = vadd.f32 %v67_v29, %v66_v24 }
  0xa3   :  { %v81_v16 = vpop.xlane.xlu0 %80 }
  0xa4   :  { %v82_v18 = vadd.f32 %v81_v16, %v77_v15 }
  0xa6   :  { %84 = vst.msk [vmem:[#allocation2] sm:$0x3] %vm32_vm0, %v82_v18 }
  0xa7   :  { %v44_v21 = vpop.permute.xlu0 %43 }
  0xa8   :  { %v52_v22 = vmul.f32 %v44_v21, %v34_v19 }
  0xaa   :  { %v55_v23 = vsel %vm54_vm3, %v52_v22, 0.0 }
  0xab   :  { %v56_v25 = vrot.slane %v55_v23, 4 }
  0xad   :  { %v89_v26 = vld [vmem:[#allocation2] sm:$0x3]  ;;  %v57_v27 = vadd.f32 %v56_v25, %v55_v23 }
  0xae   :  { %v90_v28 = vmax.f32 %v89_v26, 1e-09 }
  0xaf   :  { %v58_v30 = vrot.slane %v57_v27, 2 }
  0xb0   :  { %93 = vperm.xlu1 %120, %v90_v28  }
  0xb1   :  { %v59_v31 = vadd.f32 %v58_v30, %v57_v27 }
  0xb3   :  { %v60_v33 = vrot.slane %v59_v31, 1 }
  0xb5   :  { %v61_v35 = vadd.f32 %v60_v33, %v59_v31 }
  0xb7   :  { %v72_v36 = vsel %vm71_vm4, %v68_v32, %v61_v35 }
  0xb8   :  { %v74_v37 = vadd.f32 %v72_v36, %v37_v34 }
  0xba   :  { %76 = vst.msk [vmem:[#allocation6] sm:$0x3] %vm30_vm2, %v74_v37 }
  0xc1   :  { %v88_v40 = vld [vmem:[#allocation6] sm:$0x3] }
 0x12f   :  { %v94_v38 = vpop.permute.xlu1 %93 }
 0x130   :  { %122 = vrcp.f32 %v94_v38 }
 0x13a   :  { %v123_v39 = vpop.eup %122 }
 0x13b   :  { %v97_v41 = vmul.f32 %v123_v39, %v88_v40 }
 0x13d   :  { %98 = vst.msk [vmem:[#allocation6] sm:$0x3] %vm30_vm2, %v97_v41 }
 0x13e   :  { %157 = shalt.err (!%p154_p12)
}
 0x13f   :  { %s158_s28 = scalar_lea.hbm %s227_s2, 32 }
 0x140   :  { %p159_p13 = scmp.ne.s32.totalorder %s227_s2, %s158_s28  ;;  %p162_p0 = scmp.lt.u32.totalorder %s158_s28, %s227_s2 }
 0x142   :  { %p164_p1 = pnand %p162_p0, %p159_p13 }
 0x144   :  { %167 = shalt.err (!%p164_p1)
}
 0x145   :  { %108 = dma.vmem_to_hbm [thread:$0]  %s106_s1, 32, %s227_s2, [#allocation5]  }
 0x146   :  { %170 = dma.done.wait [#allocation5], 32  }
 0x147   :  { %171 = vsyncadd [#allocation5], 4294967264 }
 0x148   :  { %112 = vsyncpa [#allocation4], 1 }
 0x149   :  { %113 = vsyncpa [#allocation5], 1 }

</bundles_post_ra>
